<compile_context>
chip_gen: v7x
topology: tpu7x:2x2x1
jax: 0.10.0
libtpu: 0.0.40
codegen_flags: <defaults>
</compile_context>

<pallas_src>
import functools

import jax
import jax.numpy as jnp
from jax import lax
from jax.experimental import pallas as pl
from jax.experimental.pallas import tpu as pltpu


def _round_up(v, m):
    return ((v + m - 1) // m) * m


def _pad_axis(a, axis, target):
    pad = target - a.shape[axis]
    if pad == 0:
        return a
    widths = [(0, 0)] * a.ndim
    widths[axis] = (0, pad)
    return jnp.pad(a, widths)


def _poisson_approx_gauss_kernel(x_ref, h_ref, s_ref, noise_ref, o_ref, acc_ref,
                                 *, alpha_half):
    k = pl.program_id(2)

    @pl.when(k == 0)
    def _():
        acc_ref[...] = jnp.zeros_like(acc_ref)

    # (tb, tk) x (tm, tk)^T -> (tb, tm). The MXU handles a transposed RHS
    # natively, so H streams in its natural (M, N) layout. Operands stay bf16
    # (fast MXU path); accumulation is f32 in the VMEM scratch.
    acc_ref[...] += lax.dot_general(
        x_ref[...], h_ref[...],
        dimension_numbers=(((1,), (1,)), ((), ())),
        preferred_element_type=jnp.float32,
    )

    @pl.when(k == pl.num_programs(2) - 1)
    def _():
        # alpha * H @ ((x+1)/2) == (alpha/2) * (x @ H^T) + (alpha/2) * H.sum(1)
        y = alpha_half * acc_ref[...] + s_ref[...]        # (tb,tm) + (1,tm)
        y = jnp.maximum(y, 0.0)                           # F.relu
        y = y + jnp.sqrt(y) * noise_ref[...].astype(jnp.float32)
        o_ref[...] = y.astype(o_ref.dtype)


def poisson_approx_gauss(x, H, noise, alpha, *,
                         tb=256, tm=512, tk=512,
                         compute_dtype=jnp.bfloat16):
    """x: (*, N) in [-1, 1]; H: (M, N); noise: (*, M) standard normal."""
    M, N = H.shape
    lead_shape = x.shape[:-1]
    assert x.shape[-1] == N and noise.shape == lead_shape + (M,)
    out_dtype = x.dtype
    alpha = float(alpha)

    # Flatten leading batch dims to a single 2-D problem (B, N) -> (B, M).
    x2 = x.reshape(-1, N)
    n2 = noise.reshape(-1, M)
    B = x2.shape[0]

    # Clamp tiles to the (padded) problem; 16-sublane alignment for bf16 rows,
    # 128-lane alignment for the M / K axes.  K stays the last grid axis.
    tb = min(tb, _round_up(B, 16))
    tm = min(tm, _round_up(M, 128))
    tk = min(tk, _round_up(N, 128))
    Bp, Mp, Np = _round_up(B, tb), _round_up(M, tm), _round_up(N, tk)

    # Precomputed affine correction (f32, exact): s[m] = (alpha/2) * sum_n H[m, n].
    s = (0.5 * alpha) * jnp.sum(H.astype(jnp.float32), axis=1)[None, :]   # (1, M)

    # bf16 operands fed straight to the MXU; zero-padding is exact.
    x_c = _pad_axis(_pad_axis(x2.astype(compute_dtype), 0, Bp), 1, Np)
    h_c = _pad_axis(_pad_axis(H.astype(compute_dtype), 0, Mp), 1, Np)
    s_p = _pad_axis(s, 1, Mp)
    n_p = _pad_axis(_pad_axis(n2.astype(jnp.float32), 0, Bp), 1, Mp)

    grid = (Bp // tb, Mp // tm, Np // tk)
    kernel = functools.partial(_poisson_approx_gauss_kernel, alpha_half=0.5 * alpha)

    # Explicit VMEM budget: double-buffered tiles + f32 accumulator + headroom.
    cbytes = jnp.dtype(compute_dtype).itemsize
    tile_bytes = (tb * tk * cbytes            # x tile
                  + tm * tk * cbytes          # H tile
                  + tb * tm * 4               # noise tile (f32)
                  + tm * 4                    # s tile
                  + tb * tm * jnp.dtype(out_dtype).itemsize)   # out tile
    vmem_limit = 2 * tile_bytes + tb * tm * 4 + (4 << 20)
    vmem_limit = int(min(max(vmem_limit, 16 << 20), 64 << 20))

    out = pl.pallas_call(
        kernel,
        out_shape=jax.ShapeDtypeStruct((Bp, Mp), out_dtype),
        grid_spec=pltpu.PrefetchScalarGridSpec(
            num_scalar_prefetch=0,
            grid=grid,
            in_specs=[
                pl.BlockSpec((tb, tk), lambda b, m, k: (b, k)),   # x (bf16)
                pl.BlockSpec((tm, tk), lambda b, m, k: (m, k)),   # H (bf16, natural layout)
                pl.BlockSpec((1, tm), lambda b, m, k: (0, m)),    # s correction (f32)
                pl.BlockSpec((tb, tm), lambda b, m, k: (b, m)),   # noise (f32)
            ],
            out_specs=pl.BlockSpec((tb, tm), lambda b, m, k: (b, m)),
            scratch_shapes=[pltpu.VMEM((tb, tm), jnp.float32)],
        ),
        compiler_params=pltpu.CompilerParams(
            dimension_semantics=("parallel", "parallel", "arbitrary"),
            vmem_limit_bytes=vmem_limit,
        ),
    )(x_c, h_c, s_p, n_p)

    return out[:B, :M].reshape(lead_shape + (M,))


if __name__ == "__main__":
    # Shapes from the spyrit docstring example: batch of 10 flattened 32x32
    # images, M = 400 measurements, alpha = 10 photoelectrons.
    B, N, M = 10, 32 * 32, 400
    alpha = 10.0

    key = jax.random.PRNGKey(0)
    kx, kh, kn = jax.random.split(key, 3)

    x = jax.random.uniform(kx, (B, N), jnp.float32, minval=-1.0, maxval=1.0)
    H = jax.random.uniform(kh, (M, N), jnp.float32)        # deterministic "weights"
    noise = jax.random.normal(kn, (B, M), jnp.float32)      # torch.randn_like equivalent

    out = poisson_approx_gauss(x, H, noise, alpha)
    out = jax.block_until_ready(out)
    assert out.shape == (B, M)

    # Reference with matching bf16 operand rounding (f32 accumulation).
    xb = x.astype(jnp.bfloat16).astype(jnp.float32)
    hb = H.astype(jnp.bfloat16).astype(jnp.float32)
    s = (alpha / 2.0) * jnp.sum(H, axis=1)[None, :]
    y_ref = (alpha / 2.0) * jnp.dot(xb, hb.T, precision="highest") + s
    y_ref = jnp.maximum(y_ref, 0.0)
    ref = y_ref + jnp.sqrt(y_ref) * noise
    assert jnp.allclose(out, ref, rtol=2e-3, atol=1e-2), "mismatch vs bf16 reference"

    # Loose sanity check against the full-precision (f32) module semantics.
    y_full = alpha * (((x + 1.0) * 0.5) @ H.T)
    y_full = jnp.maximum(y_full, 0.0)
    ref_full = y_full + jnp.sqrt(y_full) * noise
    assert jnp.allclose(out, ref_full, rtol=1e-2, atol=1.0), "mismatch vs f32 reference"

    print("KERNEL_OK")
</pallas_src>

<mosaic_0001>
module attributes {stable_mosaic.version = 11 : i64} {
  func.func @_poisson_approx_gauss_kernel(%arg0: i32, %arg1: i32, %arg2: i32, %arg3: memref<16x512xbf16, #tpu.memory_space<vmem>>, %arg4: memref<512x512xbf16, #tpu.memory_space<vmem>>, %arg5: memref<1x512xf32, #tpu.memory_space<vmem>>, %arg6: memref<16x512xf32, #tpu.memory_space<vmem>>, %arg7: memref<16x512xf32, #tpu.memory_space<vmem>>, %arg8: memref<16x512xf32, #tpu.memory_space<vmem>>) attributes {dimension_semantics = [#tpu.dimension_semantics<parallel>, #tpu.dimension_semantics<parallel>, #tpu.dimension_semantics<arbitrary>], iteration_bounds = array<i64: 1, 1, 2>, scalar_prefetch = 0 : i64, scratch_operands = 1 : i64, tpu.core_type = #tpu.core_type<tc>, window_params = [{transform_indices = @transform_0, window_bounds = array<i64: 16, 512>}, {transform_indices = @transform_1, window_bounds = array<i64: 512, 512>}, {transform_indices = @transform_2, window_bounds = array<i64: 1, 512>}, {transform_indices = @transform_3, window_bounds = array<i64: 16, 512>}, {transform_indices = @transform_4, window_bounds = array<i64: 16, 512>}]} {
    %c0_i32 = arith.constant 0 : i32
    %0 = arith.cmpi eq, %arg2, %c0_i32 : i32
    %1 = arith.extui %0 : i1 to i32
    %c0_i32_0 = arith.constant 0 : i32
    %2 = arith.cmpi ne, %1, %c0_i32_0 : i32
    scf.if %2 {
      %cst_9 = arith.constant 0.000000e+00 : f32
      %12 = vector.broadcast %cst_9 : f32 to vector<16x512xf32>
      %c0_10 = arith.constant 0 : index
      %c0_11 = arith.constant 0 : index
      %13 = vector.load %arg8[%c0_10, %c0_11] : memref<16x512xf32, #tpu.memory_space<vmem>>, vector<16x512xf32>
      tpu.vector_store %arg8[%c0_10, %c0_11], %12 {strides = array<i32>} : memref<16x512xf32, #tpu.memory_space<vmem>>, vector<16x512xf32>,
    } else {
    }
    %c0 = arith.constant 0 : index
    %c0_1 = arith.constant 0 : index
    %3 = vector.load %arg8[%c0, %c0_1] : memref<16x512xf32, #tpu.memory_space<vmem>>, vector<16x512xf32>
    %c0_2 = arith.constant 0 : index
    %c0_3 = arith.constant 0 : index
    %4 = vector.load %arg3[%c0_2, %c0_3] : memref<16x512xbf16, #tpu.memory_space<vmem>>, vector<16x512xbf16>
    %c0_4 = arith.constant 0 : index
    %c0_5 = arith.constant 0 : index
    %5 = vector.load %arg4[%c0_4, %c0_5] : memref<512x512xbf16, #tpu.memory_space<vmem>>, vector<512x512xbf16>
    %cst = arith.constant dense<0.000000e+00> : vector<16x512xf32>
    %6 = tpu.matmul %4, %5, %cst {dimension_numbers = #tpu.dot_dimension_numbers<[1], [1], [0], [0], [0, 0, 1, 0], [], []>} : vector<16x512xbf16>, vector<512x512xbf16>, vector<16x512xf32> -> vector<16x512xf32>
    %7 = arith.addf %3, %6 : vector<16x512xf32>
    %c0_6 = arith.constant 0 : index
    %c0_7 = arith.constant 0 : index
    %8 = vector.load %arg8[%c0_6, %c0_7] : memref<16x512xf32, #tpu.memory_space<vmem>>, vector<16x512xf32>
    tpu.vector_store %arg8[%c0_6, %c0_7], %7 {strides = array<i32>} : memref<16x512xf32, #tpu.memory_space<vmem>>, vector<16x512xf32>,
    %c1_i32 = arith.constant 1 : i32
    %9 = arith.cmpi eq, %arg2, %c1_i32 : i32
    %10 = arith.extui %9 : i1 to i32
    %c0_i32_8 = arith.constant 0 : i32
    %11 = arith.cmpi ne, %10, %c0_i32_8 : i32
    scf.if %11 {
      %c0_9 = arith.constant 0 : index
      %c0_10 = arith.constant 0 : index
      %12 = vector.load %arg8[%c0_9, %c0_10] : memref<16x512xf32, #tpu.memory_space<vmem>>, vector<16x512xf32>
      %cst_11 = arith.constant 5.000000e+00 : f32
      %13 = vector.broadcast %cst_11 : f32 to vector<16x512xf32>
      %14 = arith.mulf %13, %12 : vector<16x512xf32>
      %c0_12 = arith.constant 0 : index
      %c0_13 = arith.constant 0 : index
      %15 = vector.load %arg5[%c0_12, %c0_13] : memref<1x512xf32, #tpu.memory_space<vmem>>, vector<1x512xf32>
      %16 = vector.broadcast %15 : vector<1x512xf32> to vector<16x512xf32>
      %17 = arith.addf %14, %16 : vector<16x512xf32>
      %cst_14 = arith.constant 0.000000e+00 : f32
      %18 = vector.broadcast %cst_14 : f32 to vector<16x512xf32>
      %19 = arith.maximumf %17, %18 : vector<16x512xf32>
      %20 = math.sqrt %19 : vector<16x512xf32>
      %c0_15 = arith.constant 0 : index
      %c0_16 = arith.constant 0 : index
      %21 = vector.load %arg6[%c0_15, %c0_16] : memref<16x512xf32, #tpu.memory_space<vmem>>, vector<16x512xf32>
      %22 = arith.mulf %20, %21 : vector<16x512xf32>
      %23 = arith.addf %19, %22 : vector<16x512xf32>
      %c0_17 = arith.constant 0 : index
      %c0_18 = arith.constant 0 : index
      %24 = vector.load %arg7[%c0_17, %c0_18] : memref<16x512xf32, #tpu.memory_space<vmem>>, vector<16x512xf32>
      tpu.vector_store %arg7[%c0_17, %c0_18], %23 {strides = array<i32>} : memref<16x512xf32, #tpu.memory_space<vmem>>, vector<16x512xf32>,
    } else {
    }
    return
  }
  func.func @transform_0(%arg0: i32, %arg1: i32, %arg2: i32) -> (i32, i32) {
    %c0_i32 = arith.constant 0 : i32
    return %arg0, %arg2 : i32, i32
  }
  func.func @transform_1(%arg0: i32, %arg1: i32, %arg2: i32) -> (i32, i32) {
    %c0_i32 = arith.constant 0 : i32
    return %arg1, %arg2 : i32, i32
  }
  func.func @transform_2(%arg0: i32, %arg1: i32, %arg2: i32) -> (i32, i32) {
    %c0_i32 = arith.constant 0 : i32
    %c0_i32_0 = arith.constant 0 : i32
    return %c0_i32, %arg1 : i32, i32
  }
  func.func @transform_3(%arg0: i32, %arg1: i32, %arg2: i32) -> (i32, i32) {
    %c0_i32 = arith.constant 0 : i32
    return %arg0, %arg1 : i32, i32
  }
  func.func @transform_4(%arg0: i32, %arg1: i32, %arg2: i32) -> (i32, i32) {
    %c0_i32 = arith.constant 0 : i32
    return %arg0, %arg1 : i32, i32
  }
}

</mosaic_0001>

<bundles_post_ra>
// kernel: tpu_custom_call.1
= control target key start
LH: loop header
LB: loop body
LE: loop exit
PB: predicated region body
PF: predicated region fallthrough
CT: control target
= control target key end

     0   :  { %s2768_s0 = inlined_call_operand.hbm [shape: bf16[16,1024], index: 0, kind: input, shape index: {}]   ;;  %s2769_s1 = inlined_call_operand.hbm [shape: bf16[512,1024], index: 1, kind: input, shape index: {}]   ;;  %s2770_s2 = inlined_call_operand.vmem [shape: f32[1,512], index: 2, kind: input, shape index: {}]   ;;  %s2771_s3 = inlined_call_operand.hbm [shape: f32[16,512], index: 3, kind: input, shape index: {}]   ;;  %s2772_s4 = inlined_call_operand.hbm [shape: f32[16,512], index: 4, kind: output, shape index: {}]  }
   0x1   :  { %2777 = sst [smem:[#allocation14_spill]] %s2768_s0 }
   0x2   :  { %2778 = sst [smem:[#allocation15_spill]] %s2771_s3 }
   0x3   :  { %9 = vsyncpa [#allocation4], 0 }
   0x4   :  { %11 = vsyncpa [#allocation4 + $0x1], 0 }
   0x5   :  { %12 = vsyncpa [#allocation7], 0 }
   0x6   :  { %14 = vsyncpa [#allocation7 + $0x1], 0 }
   0x7   :  { %15 = vsyncpa [#allocation5], 0  ;;  %s2293_s15 = smov 0   ;;  %s2295_s16 = smov 0  }
   0x8   :  { %s2297_s17 = smov 0   ;;  %s2299_s18 = smov 0  }
   0x9   :  { %s2301_s19 = smov 0   ;;  %s2303_s20 = smov 0  }
   0xa LB: > { %s2322_s21 = sadd.s32 4294967295, %s2255_s20   ;;  %s49_s22 = sadd.s32 1, %s2243_s17  ;;  %s2255_s20 = sphi %s2303_s20, %s21_s20   ;;  %s2251_s19 = sphi %s2301_s19, %s2794_s19   ;;  %s2247_s18 = sphi %s2299_s18, %s2793_s18   ;;  %s2243_s17 = sphi %s2297_s17, %s2792_s17   ;;  %s2239_s16 = sphi %s2295_s16, %s2791_s16   ;;  %s2235_s15 = sphi %s2293_s15, %s2790_s15  }
   0xb   : > { %p56_p0 = scmp.ne.s32.totalorder %s2243_s17, %s2239_s16  ;;  %p57_p1 = scmp.eq.s32.totalorder %s2255_s20, 0 }
   0xc   : > { %p62_p2 = scmp.ne.s32.totalorder %s2239_s16, %s2235_s15  ;;  %p2773_p3 = scmp.eq.s32.totalorder %s2322_s21, 0 }
   0xd   : > { %p58_p4 = por %p57_p1, %p56_p0  ;;  %p1618_p5 = scmp.ge.s32.totalorder %s2255_s20, 1 }
   0xe   : > { %p2333_p6 = por %p2773_p3, %p62_p2  ;;  %p183_p7 = scmp.lt.s32.totalorder %s2255_s20, 3 }
   0xf   : > { %s2257_s25 = smov [#allocation8]   ;;  %p1804_p10 = scmp.lt.s32.totalorder %s2255_s20, 2 }
  0x10   : > { %s2779_s23 = scalar_select %p2333_p6, 1, 0 }
  0x11   : > { %p2338_p8 = pnand %p1618_p5, %p183_p7  ;;  %s209_s26 = sshll.u32 %s2257_s25, 4  ;;  %s210_s26 = int_to_ptr.vmem [resolvable:$true] %s209_s26 }
  0x12   : > { %p2351_p12 = pnand %p1804_p10, %p58_p4  ;;  %s33_s29 = sadd.s32 1, %s2251_s19 }
  0x13   : > { %s2780_s24 = scalar_select %p2338_p8, 1, 0 }
  0x14   : > { %p1792_p9 = pneg %p2338_p8  ;;  %s2783_s3 = sld [smem:[#allocation15_spill]] }
  0x15   : > { %s2782_s28 = scalar_select %p2351_p12, 1, 0 }
  0x16   : > { %p2347_p11 = pnand %p1792_p9, %p2773_p3 }
  0x18   : > { %p2081_p0 = pneg %p2347_p11 }
  0x1a   : > { %s2079_s6 = scalar_lea.hbm %s2783_s3, 1024 }
  0x1b   : > { %p2080_p13 = scmp.ne.s32.totalorder %s2783_s3, %s2079_s6  ;;  %p2086_p4 = scmp.lt.u32.totalorder %s2079_s6, %s2783_s3 }
  0x1d   : > { %p2082_p1 = pnand %p2081_p0, %p2080_p13 }
  0x1f   : > { %p2083_p2 = pneg %p2082_p1 }
  0x21   : > { %p2088_p5 = pnand %p2086_p4, %p2083_p2 }
  0x23   : > { %2091 = shalt.err (!%p2088_p5)
}
  0x24   : > { %s2092_s11 = scalar_lea.vmem %s210_s26, 1024  ;;  %p2100_p3 = scmp.lt.s32.totalorder %s210_s26, %s210_s26 }
  0x25   : > { %p2093_p7 = scmp.ne.s32.totalorder %s210_s26, %s2092_s11  ;;  %p2101_p6 = scmp.lt.s32.totalorder %s2092_s11, %s2092_s11 }
  0x27   : > { %p2095_p9 = pnand %p2093_p7, %p2081_p0  ;;  %p2102_p8 = por %p2101_p6, %p2100_p3 }
  0x29   : > { %p2096_p10 = pneg %p2095_p9 }
  0x2b   : > { %p2103_p12 = pnand %p2102_p8, %p2096_p10 }
  0x2d   : > { %2106 = shalt.err (!%p2103_p12)
}
  0x2e   : > { %s2258_s12 = smov 512   ;;  %s2259_s13 = smov 32  }
  0x2f   : > { %1795 = dma.hbm_to_vmem [thread:$0]  (!%p2347_p11), %s2783_s3, 1024, %s210_s26, [#allocation7], %s2258_s12, %s2258_s12, %s2259_s13  }
  0x30   : > { %p34_p3 = scmp.ge.s32.totalorder %s33_s29, 2  ;;  %s2375_s25 = sand.u32 1, %s2243_s17  }
  0x31   : > { %s1770_s30 = sshll.u32 %s2251_s19, 8  ;;  %s1622_s5 = sshll.u32 %s2375_s25, 5 }
  0x32   : > { %s2796_s29 = smov (%p34_p3, %s33_s29), 0  ;;  %s2784_s0 = sld [smem:[#allocation14_spill]] }
  0x33   : > { %s45_s6 = ssub.s32 %s2251_s19, %s2796_s29  ;;  %s227_s26 = scalar_lea.vmem [#allocation3], %s1622_s5 }
  0x34   : > { %p47_p6 = scmp.eq.s32.totalorder %s45_s6, 0  ;;  %s237_s9 = sshll.u32 %s227_s26, 4  ;;  %s2395_s9 = int_to_ptr.vmem [resolvable:$true] %s237_s9 }
  0x35   : > { %s224_s11 = scalar_lea.sflag [#allocation4], %s2375_s25  ;;  %p2785_p11 = scmp.ne.s32.totalorder %s2782_s28, 0 }
  0x36   : > { %s2393_s10 = scalar_select %p47_p6, %s2243_s17, %s49_s22  }
  0x37   : > { %p2109_p12 = pneg %p2785_p11 }
  0x38   : > { %s2388_s8 = scalar_lea.hbm %s2784_s0, %s1770_s30  ;;  %s2112_s6 = scalar_lea.hbm %s2784_s0, 1024 }
  0x39   : > { %s2107_s13 = scalar_lea.hbm %s2388_s8, 512  ;;  %p2113_p1 = scmp.lt.u32.totalorder %s2388_s8, %s2784_s0 }
  0x3a   : > { %p2108_p8 = scmp.ne.s32.totalorder %s2388_s8, %s2107_s13  ;;  %p2114_p2 = scmp.lt.u32.totalorder %s2112_s6, %s2107_s13 }
  0x3b   : > { %p2116_p5 = scmp.lt.u32.totalorder %s2107_s13, %s2388_s8 }
  0x3c   : > { %p2110_p13 = pnand %p2109_p12, %p2108_p8  ;;  %p2115_p4 = por %p2114_p2, %p2113_p1 }
  0x3e   : > { %p2111_p0 = pneg %p2110_p13  ;;  %p2117_p7 = por %p2116_p5, %p2115_p4 }
  0x40   : > { %p2118_p9 = pnand %p2117_p7, %p2111_p0 }
  0x42   : > { %2121 = shalt.err (!%p2118_p9)
}
  0x43   : > { %s2122_s22 = scalar_lea.vmem %s2395_s9, 512  ;;  %s2260_s7 = smov [#allocation3]  }
  0x44   : > { %p2123_p10 = scmp.ne.s32.totalorder %s2395_s9, %s2122_s22  ;;  %s2127_s26 = sshll.u32 %s2260_s7, 4  ;;  %s2128_s26 = int_to_ptr.vmem [resolvable:$false] %s2127_s26 }
  0x45   : > { %s2129_s14 = scalar_lea.vmem %s2128_s26, 1024  ;;  %p2130_p8 = scmp.lt.s32.totalorder %s2395_s9, %s2128_s26 }
  0x46   : > { %p2125_p3 = pnand %p2123_p10, %p2109_p12  ;;  %p2131_p13 = scmp.lt.s32.totalorder %s2129_s14, %s2122_s22 }
  0x48   : > { %p2126_p6 = pneg %p2125_p3  ;;  %p2132_p1 = por %p2131_p13, %p2130_p8 }
  0x4a   : > { %p2133_p2 = pnand %p2132_p1, %p2126_p6 }
  0x4c   : > { %2136 = shalt.err (!%p2133_p2)
}
  0x4d   : > { %s2261_s13 = smov 256   ;;  %s2262_s15 = smov 16  }
  0x4e   : > { %1799 = dma.hbm_to_vmem [thread:$0]  (!%p2785_p11), %s2388_s8, 512, %s2395_s9, %s224_s11, %s2258_s12, %s2261_s13, %s2262_s15  }
  0x4f   : > { %s247_s6 = sand.u32 1, %s2255_s20   ;;  %s2434_s22 = scalar_lea.hbm %s2769_s1, %s1770_s30 }
  0x50   : > { %s1625_s7 = sshll.u32 %s2375_s25, 10  ;;  %s2439_s0 = scalar_lea.sflag [#allocation7], %s247_s6 }
  0x51   : > { %s251_s26 = scalar_lea.vmem [#allocation6], %s1625_s7  ;;  %s2137_s3 = scalar_lea.hbm %s2434_s22, 16384 }
  0x52   : > { %s261_s14 = sshll.u32 %s251_s26, 4  ;;  %p2138_p0 = scmp.ne.s32.totalorder %s2434_s22, %s2137_s3  ;;  %s2437_s14 = int_to_ptr.vmem [resolvable:$true] %s261_s14 }
  0x53   : > { %s2142_s9 = scalar_lea.hbm %s2769_s1, 32768  ;;  %p2143_p7 = scmp.lt.u32.totalorder %s2434_s22, %s2769_s1 }
  0x54   : > { %p2140_p4 = pnand %p2138_p0, %p2109_p12  ;;  %p2144_p9 = scmp.lt.u32.totalorder %s2142_s9, %s2137_s3 }
  0x55   : > { %p2146_p3 = scmp.lt.u32.totalorder %s2137_s3, %s2434_s22 }
  0x56   : > { %p2141_p5 = pneg %p2140_p4  ;;  %p2145_p10 = por %p2144_p9, %p2143_p7 }
  0x58   : > { %p2147_p6 = por %p2146_p3, %p2145_p10 }
  0x5a   : > { %p2148_p8 = pnand %p2147_p6, %p2141_p5 }
  0x5c   : > { %2151 = shalt.err (!%p2148_p8)
}
  0x5d   : > { %s2152_s25 = scalar_lea.vmem %s2437_s14, 16384  ;;  %s2263_s6 = smov [#allocation6]  }
  0x5e   : > { %p2153_p13 = scmp.ne.s32.totalorder %s2437_s14, %s2152_s25  ;;  %s2157_s27 = sshll.u32 %s2263_s6, 4  ;;  %s2158_s27 = int_to_ptr.vmem [resolvable:$false] %s2157_s27 }
  0x5f   : > { %s2159_s7 = scalar_lea.vmem %s2158_s27, 32768  ;;  %p2160_p0 = scmp.lt.s32.totalorder %s2437_s14, %s2158_s27 }
  0x60   : > { %p2155_p1 = pnand %p2153_p13, %p2109_p12  ;;  %p2161_p4 = scmp.lt.s32.totalorder %s2159_s7, %s2152_s25 }
  0x62   : > { %p2156_p2 = pneg %p2155_p1  ;;  %p2162_p7 = por %p2161_p4, %p2160_p0 }
  0x64   : > { %p2163_p9 = pnand %p2162_p7, %p2156_p2 }
  0x66   : > { %2166 = shalt.err (!%p2163_p9)
}
  0x67   : > { %1802 = dma.hbm_to_vmem [thread:$0]  (!%p2785_p11), %s2434_s22, 16384, %s2437_s14, %s2439_s0, %s2258_s12, %s2261_s13, %s2262_s15  }
  0x68   : > { %p2786_p12 = scmp.ne.s32.totalorder %s2780_s24, 0 }
  0x69   : > { %s275_s3 = sand.u32 (!%p2786_p12), 1, %s2239_s16   ;;  %p2787_p5 = scmp.ne.s32.totalorder (!%p2786_p12), %s2779_s23, 0 }
  0x6a   : > { %273 = sbr.rel (%p2786_p12) target bundleno = 669 (0x29d), region = 36  ;;  %s1629_s26 = sshll.u32 (!%p2786_p12), %s275_s3, 5 }
  0x6b   : > { %s276_s8 = scalar_lea.sflag (!%p2786_p12), [#allocation4], %s275_s3  ;;  %s2471_s30 = scalar_lea.vmem (!%p2786_p12), [#allocation3], %s1629_s26 }
  0x71   : > { %2218 = dma.done.wait (%p2787_p5), %s276_s8, 512  }
  0x72   : > { %2220 = vsyncadd (%p2787_p5), %s276_s8, 4294966784  ;;  %s284_s28 = sand.u32 1, %s2322_s21   ;;  %s1630_s9 = sshll.u32 %s275_s3, 10 }
  0x73   : > { %s285_s0 = scalar_lea.sflag [#allocation7], %s284_s28  ;;  %s2478_s12 = scalar_lea.vmem [#allocation6], %s1630_s9 }
  0x74   : > { %2222 = dma.done.wait (%p2787_p5), %s285_s0, 16384  }
  0x75   : > { %2224 = vsyncadd (%p2787_p5), %s285_s0, 4294950912  ;;  %p2788_p11 = scmp.eq.s32.totalorder %s2322_s21, 0 }
  0x77   : > { %2226 = dma.done.wait (%p2788_p11), [#allocation7], 1024   ;;  %p2789_p10 = pmov %p2788_p11 }
  0x78   : > { %p1632_p3 = scmp.ne.s32.totalorder %s2247_s18, 0 }
  0x79   : > { %2228 = vsyncadd (%p2789_p10), [#allocation7], 4294966272  ;;  %v2264_v0 = vmov (!%p1632_p3), 0.0  }
  0x7a   : > { %337 = sbr.rel (%p1632_p3) target bundleno = 129 (0x81), region = 52  ;;  %338 = vst [vmem:[#allocation2] sm:$0xff] (!%p1632_p3), %v2264_v0  ;;  %339 = vst [vmem:[#allocation2 + $0x8] sm:$0xff] (!%p1632_p3), %v2264_v0 }
  0x7b   : > { %340 = vst [vmem:[#allocation2 + $0x10] sm:$0xff] (!%p1632_p3), %v2264_v0  ;;  %341 = vst [vmem:[#allocation2 + $0x18] sm:$0xff] (!%p1632_p3), %v2264_v0 }
  0x7c   : > { %342 = vst [vmem:[#allocation2 + $0x20] sm:$0xff] (!%p1632_p3), %v2264_v0  ;;  %343 = vst [vmem:[#allocation2 + $0x28] sm:$0xff] (!%p1632_p3), %v2264_v0 }
  0x7d   : > { %344 = vst [vmem:[#allocation2 + $0x30] sm:$0xff] (!%p1632_p3), %v2264_v0  ;;  %345 = vst [vmem:[#allocation2 + $0x38] sm:$0xff] (!%p1632_p3), %v2264_v0 }
  0x81 PF: > { %v1865_v1 = vld [vmem:[%s2478_s12 + $0x4] ss:$16 sps:$4 sm:$0xff]   ;;  %v1869_v3 = vld [vmem:[%s2478_s12] ss:$16 sps:$4 sm:$0xff]   ;;  %p1765_p6 = scmp.ne.s32.totalorder %s2247_s18, 1 }
  0x82   : > { %v1867_v2 = vld [vmem:[%s2478_s12 + $0x204] ss:$16 sps:$4 sm:$0xff]   ;;  %1146 = vmatprep.subr.bf16.mxu0 %v1865_v1  ;;  %v1870_v4 = vld [vmem:[%s2478_s12 + $0x200] ss:$16 sps:$4 sm:$0xff]  }
  0x83   : > { %1232 = vmatprep.subr.bf16.mxu1 %v1867_v2  ;;  %v1871_v5 = vld [vmem:[%s2478_s12 + $0x24] ss:$16 sps:$4 sm:$0xff]   ;;  %1147 = vmatpush1.bf16.xpose.msra.mxu0 %v1869_v3  ;;  %v1875_v7 = vld [vmem:[%s2478_s12 + $0x20] ss:$16 sps:$4 sm:$0xff]   ;;  %v1966_v2 = vld [vmem:[%s2478_s12 + $0xc] ss:$16 sps:$4 sm:$0xff]  }
  0x84   : > { %1233 = vmatpush1.bf16.xpose.msra.mxu1 %v1870_v4  ;;  %v1873_v6 = vld [vmem:[%s2478_s12 + $0x224] ss:$16 sps:$4 sm:$0xff]   ;;  %1148 = vmatprep.subr.bf16.mxu0 %v1871_v5  ;;  %v1876_v8 = vld [vmem:[%s2478_s12 + $0x220] ss:$16 sps:$4 sm:$0xff]   ;;  %v1969_v3 = vld [vmem:[%s2478_s12 + $0x20c] ss:$16 sps:$4 sm:$0xff]  }
  0x85   : > { %1234 = vmatprep.subr.bf16.mxu1 %v1873_v6  ;;  %v1877_v9 = vld [vmem:[%s2478_s12 + $0x44] ss:$16 sps:$4 sm:$0xff]   ;;  %v1881_v11 = vld [vmem:[%s2478_s12 + $0x40] ss:$16 sps:$4 sm:$0xff]   ;;  %v1964_v5 = vld [vmem:[%s2478_s12 + $0x8] ss:$16 sps:$4 sm:$0xff]  }
  0x86   : > { %v1879_v10 = vld [vmem:[%s2478_s12 + $0x244] ss:$16 sps:$4 sm:$0xff]   ;;  %v1882_v12 = vld [vmem:[%s2478_s12 + $0x240] ss:$16 sps:$4 sm:$0xff]   ;;  %v1967_v6 = vld [vmem:[%s2478_s12 + $0x208] ss:$16 sps:$4 sm:$0xff]  }
  0x87   : > { %v1883_v13 = vld [vmem:[%s2478_s12 + $0x64] ss:$16 sps:$4 sm:$0xff]   ;;  %v1887_v15 = vld [vmem:[%s2478_s12 + $0x60] ss:$16 sps:$4 sm:$0xff]  }
  0x88   : > { %v1885_v14 = vld [vmem:[%s2478_s12 + $0x264] ss:$16 sps:$4 sm:$0xff]   ;;  %v1888_v16 = vld [vmem:[%s2478_s12 + $0x260] ss:$16 sps:$4 sm:$0xff]  }
  0x89   : > { %v1889_v17 = vld [vmem:[%s2478_s12 + $0x84] ss:$16 sps:$4 sm:$0xff]   ;;  %v1893_v19 = vld [vmem:[%s2478_s12 + $0x80] ss:$16 sps:$4 sm:$0xff]  }
  0x8a   : > { %v1891_v18 = vld [vmem:[%s2478_s12 + $0x284] ss:$16 sps:$4 sm:$0xff]   ;;  %v1894_v20 = vld [vmem:[%s2478_s12 + $0x280] ss:$16 sps:$4 sm:$0xff]  }
  0x8b   : > { %1149 = vmatpush1.bf16.xpose.msra.mxu0 %v1875_v7  ;;  %v1895_v21 = vld [vmem:[%s2478_s12 + $0xa4] ss:$16 sps:$4 sm:$0xff]   ;;  %v1899_v23 = vld [vmem:[%s2478_s12 + $0xa0] ss:$16 sps:$4 sm:$0xff]   ;;  %v1972_v7 = vld [vmem:[%s2478_s12 + $0x2c] ss:$16 sps:$4 sm:$0xff]  }
  0x8c   : > { %1235 = vmatpush1.bf16.xpose.msra.mxu1 %v1876_v8  ;;  %1150 = vmatprep.subr.bf16.mxu0 %v1877_v9  ;;  %v1897_v22 = vld [vmem:[%s2478_s12 + $0x2a4] ss:$16 sps:$4 sm:$0xff]   ;;  %v1900_v24 = vld [vmem:[%s2478_s12 + $0x2a0] ss:$16 sps:$4 sm:$0xff]   ;;  %v1975_v8 = vld [vmem:[%s2478_s12 + $0x22c] ss:$16 sps:$4 sm:$0xff]  }
  0x8d   : > { %1236 = vmatprep.subr.bf16.mxu1 %v1879_v10  ;;  %v1901_v25 = vld [vmem:[%s2478_s12 + $0xc4] ss:$16 sps:$4 sm:$0xff]   ;;  %v1905_v28 = vld [vmem:[%s2478_s12 + $0xc0] ss:$16 sps:$4 sm:$0xff]   ;;  %v2062_v9 = vld [vmem:[%s2471_s30 + $0xc] ss:$16 sps:$4 sm:$0xff]  }
  0x8e   : > { %v1903_v26 = vld [vmem:[%s2478_s12 + $0x2c4] ss:$16 sps:$4 sm:$0xff]   ;;  %v1906_v29 = vld [vmem:[%s2478_s12 + $0x2c0] ss:$16 sps:$4 sm:$0xff]   ;;  %v1970_v10 = vld [vmem:[%s2478_s12 + $0x28] ss:$16 sps:$4 sm:$0xff]  }
  0x8f   : > { %v1963_v27 = vld [vmem:[%s2471_s30 + $0x4] ss:$16 sps:$4 sm:$0xff]   ;;  %v1911_v32 = vld [vmem:[%s2478_s12 + $0xe0] ss:$16 sps:$4 sm:$0xff]  }
  0x90   : > { %1178 = vmatprep.mubr.bf16.mxu0 %v1963_v27  ;;  %1264 = vmatprep.mubr.bf16.mxu1 %v1963_v27  ;;  %v1907_v30 = vld [vmem:[%s2478_s12 + $0xe4] ss:$16 sps:$4 sm:$0xff]   ;;  %v1912_v33 = vld [vmem:[%s2478_s12 + $0x2e0] ss:$16 sps:$4 sm:$0xff]   ;;  %v1997_v27 = vld [vmem:[%s2478_s12 + $0x2a8] ss:$16 sps:$4 sm:$0xff]  }
  0x91   : > { %v1909_v31 = vld [vmem:[%s2478_s12 + $0x2e4] ss:$16 sps:$4 sm:$0xff]   ;;  %v1917_v36 = vld [vmem:[%s2478_s12 + $0x100] ss:$16 sps:$4 sm:$0xff]  }
  0x92   : > { %v1913_v34 = vld [vmem:[%s2478_s12 + $0x104] ss:$16 sps:$4 sm:$0xff]   ;;  %v1918_v37 = vld [vmem:[%s2478_s12 + $0x300] ss:$16 sps:$4 sm:$0xff]  }
  0x93   : > { %1151 = vmatpush1.bf16.xpose.msra.mxu0 %v1881_v11  ;;  %v1915_v35 = vld [vmem:[%s2478_s12 + $0x304] ss:$16 sps:$4 sm:$0xff]   ;;  %v1923_v40 = vld [vmem:[%s2478_s12 + $0x120] ss:$16 sps:$4 sm:$0xff]   ;;  %v1973_v11 = vld [vmem:[%s2478_s12 + $0x228] ss:$16 sps:$4 sm:$0xff]  }
  0x94   : > { %1237 = vmatpush1.bf16.xpose.msra.mxu1 %v1882_v12  ;;  %1152 = vmatprep.subr.bf16.mxu0 %v1883_v13  ;;  %v1919_v38 = vld [vmem:[%s2478_s12 + $0x124] ss:$16 sps:$4 sm:$0xff]   ;;  %v1924_v41 = vld [vmem:[%s2478_s12 + $0x320] ss:$16 sps:$4 sm:$0xff]   ;;  %v1978_v12 = vld [vmem:[%s2478_s12 + $0x4c] ss:$16 sps:$4 sm:$0xff]  }
  0x95   : > { %1238 = vmatprep.subr.bf16.mxu1 %v1885_v14  ;;  %v1921_v39 = vld [vmem:[%s2478_s12 + $0x324] ss:$16 sps:$4 sm:$0xff]   ;;  %v1929_v44 = vld [vmem:[%s2478_s12 + $0x140] ss:$16 sps:$4 sm:$0xff]   ;;  %v1981_v13 = vld [vmem:[%s2478_s12 + $0x24c] ss:$16 sps:$4 sm:$0xff]  }
  0x96   : > { %v1925_v42 = vld [vmem:[%s2478_s12 + $0x144] ss:$16 sps:$4 sm:$0xff]   ;;  %v1930_v45 = vld [vmem:[%s2478_s12 + $0x340] ss:$16 sps:$4 sm:$0xff]   ;;  %v1976_v14 = vld [vmem:[%s2478_s12 + $0x48] ss:$16 sps:$4 sm:$0xff]  }
  0x97   : > { %v1927_v43 = vld [vmem:[%s2478_s12 + $0x344] ss:$16 sps:$4 sm:$0xff]   ;;  %v1935_v48 = vld [vmem:[%s2478_s12 + $0x160] ss:$16 sps:$4 sm:$0xff]  }
  0x98   : > { %v1931_v46 = vld [vmem:[%s2478_s12 + $0x164] ss:$16 sps:$4 sm:$0xff]   ;;  %v1936_v49 = vld [vmem:[%s2478_s12 + $0x360] ss:$16 sps:$4 sm:$0xff]  }
  0x99   : > { %v1933_v47 = vld [vmem:[%s2478_s12 + $0x364] ss:$16 sps:$4 sm:$0xff]   ;;  %v1941_v52 = vld [vmem:[%s2478_s12 + $0x180] ss:$16 sps:$4 sm:$0xff]  }
  0x9a   : > { %v1937_v50 = vld [vmem:[%s2478_s12 + $0x184] ss:$16 sps:$4 sm:$0xff]   ;;  %v1942_v53 = vld [vmem:[%s2478_s12 + $0x380] ss:$16 sps:$4 sm:$0xff]  }
  0x9b   : > { %1153 = vmatpush1.bf16.xpose.msra.mxu0 %v1887_v15  ;;  %v1939_v51 = vld [vmem:[%s2478_s12 + $0x384] ss:$16 sps:$4 sm:$0xff]   ;;  %v1947_v56 = vld [vmem:[%s2478_s12 + $0x1a0] ss:$16 sps:$4 sm:$0xff]   ;;  %v1979_v15 = vld [vmem:[%s2478_s12 + $0x248] ss:$16 sps:$4 sm:$0xff]  }
  0x9c   : > { %1239 = vmatpush1.bf16.xpose.msra.mxu1 %v1888_v16  ;;  %1154 = vmatprep.subr.bf16.mxu0 %v1889_v17  ;;  %v1943_v54 = vld [vmem:[%s2478_s12 + $0x1a4] ss:$16 sps:$4 sm:$0xff]   ;;  %v1948_v57 = vld [vmem:[%s2478_s12 + $0x3a0] ss:$16 sps:$4 sm:$0xff]   ;;  %v1984_v16 = vld [vmem:[%s2478_s12 + $0x6c] ss:$16 sps:$4 sm:$0xff]  }
  0x9d   : > { %1240 = vmatprep.subr.bf16.mxu1 %v1891_v18  ;;  %v1945_v55 = vld [vmem:[%s2478_s12 + $0x3a4] ss:$16 sps:$4 sm:$0xff]   ;;  %v1953_v60 = vld [vmem:[%s2478_s12 + $0x1c0] ss:$16 sps:$4 sm:$0xff]   ;;  %v1987_v17 = vld [vmem:[%s2478_s12 + $0x26c] ss:$16 sps:$4 sm:$0xff]  }
  0x9e   : > { %v1949_v58 = vld [vmem:[%s2478_s12 + $0x1c4] ss:$16 sps:$4 sm:$0xff]   ;;  %v1954_v61 = vld [vmem:[%s2478_s12 + $0x3c0] ss:$16 sps:$4 sm:$0xff]   ;;  %v1982_v18 = vld [vmem:[%s2478_s12 + $0x68] ss:$16 sps:$4 sm:$0xff]  }
  0x9f   : > { %v1951_v59 = vld [vmem:[%s2478_s12 + $0x3c4] ss:$16 sps:$4 sm:$0xff]   ;;  %v1959_v0 = vld [vmem:[%s2478_s12 + $0x1e0] ss:$16 sps:$4 sm:$0xff]  }
  0xa0   : > { %v1955_v62 = vld [vmem:[%s2478_s12 + $0x1e4] ss:$16 sps:$4 sm:$0xff]   ;;  %v1960_v1 = vld [vmem:[%s2478_s12 + $0x3e0] ss:$16 sps:$4 sm:$0xff]  }
  0xa1   : > { %v1957_v63 = vld [vmem:[%s2478_s12 + $0x3e4] ss:$16 sps:$4 sm:$0xff]   ;;  %v1961_v4 = vld [vmem:[%s2471_s30] ss:$16 sps:$4 sm:$0xff]  }
  0xa3   : > { %1155 = vmatpush1.bf16.xpose.msra.mxu0 %v1893_v19  ;;  %v1985_v19 = vld [vmem:[%s2478_s12 + $0x268] ss:$16 sps:$4 sm:$0xff]  }
  0xa4   : > { %1241 = vmatpush1.bf16.xpose.msra.mxu1 %v1894_v20  ;;  %1156 = vmatprep.subr.bf16.mxu0 %v1895_v21  ;;  %v1990_v20 = vld [vmem:[%s2478_s12 + $0x8c] ss:$16 sps:$4 sm:$0xff]  }
  0xa5   : > { %1242 = vmatprep.subr.bf16.mxu1 %v1897_v22  ;;  %v1993_v21 = vld [vmem:[%s2478_s12 + $0x28c] ss:$16 sps:$4 sm:$0xff]   ;;  %v1988_v22 = vld [vmem:[%s2478_s12 + $0x88] ss:$16 sps:$4 sm:$0xff]  }
  0xab   : > { %1157 = vmatpush1.bf16.xpose.msra.mxu0 %v1899_v23  ;;  %v1991_v23 = vld [vmem:[%s2478_s12 + $0x288] ss:$16 sps:$4 sm:$0xff]  }
  0xac   : > { %1243 = vmatpush1.bf16.xpose.msra.mxu1 %v1900_v24  ;;  %1158 = vmatprep.subr.bf16.mxu0 %v1901_v25  ;;  %v1996_v24 = vld [vmem:[%s2478_s12 + $0xac] ss:$16 sps:$4 sm:$0xff]  }
  0xad   : > { %1244 = vmatprep.subr.bf16.mxu1 %v1903_v26  ;;  %v1999_v25 = vld [vmem:[%s2478_s12 + $0x2ac] ss:$16 sps:$4 sm:$0xff]   ;;  %v1994_v26 = vld [vmem:[%s2478_s12 + $0xa8] ss:$16 sps:$4 sm:$0xff]  }
  0xb3   : > { %1159 = vmatpush1.bf16.xpose.msra.mxu0 %v1905_v28  ;;  %v2002_v28 = vld [vmem:[%s2478_s12 + $0xcc] ss:$16 sps:$4 sm:$0xff]  }
  0xb4   : > { %1245 = vmatpush1.bf16.xpose.msra.mxu1 %v1906_v29  ;;  %1160 = vmatprep.subr.bf16.mxu0 %v1907_v30  ;;  %v2005_v29 = vld [vmem:[%s2478_s12 + $0x2cc] ss:$16 sps:$4 sm:$0xff]   ;;  %v2000_v30 = vld [vmem:[%s2478_s12 + $0xc8] ss:$16 sps:$4 sm:$0xff]  }
  0xb5   : > { %1246 = vmatprep.subr.bf16.mxu1 %v1909_v31  ;;  %v2003_v31 = vld [vmem:[%s2478_s12 + $0x2c8] ss:$16 sps:$4 sm:$0xff]  }
  0xbb   : > { %1161 = vmatpush1.bf16.xpose.msra.mxu0 %v1911_v32  ;;  %v2008_v32 = vld [vmem:[%s2478_s12 + $0xec] ss:$16 sps:$4 sm:$0xff]  }
  0xbc   : > { %1247 = vmatpush1.bf16.xpose.msra.mxu1 %v1912_v33  ;;  %1162 = vmatprep.subr.bf16.mxu0 %v1913_v34  ;;  %v2011_v33 = vld [vmem:[%s2478_s12 + $0x2ec] ss:$16 sps:$4 sm:$0xff]   ;;  %v2006_v34 = vld [vmem:[%s2478_s12 + $0xe8] ss:$16 sps:$4 sm:$0xff]  }
  0xbd   : > { %1248 = vmatprep.subr.bf16.mxu1 %v1915_v35  ;;  %v2009_v35 = vld [vmem:[%s2478_s12 + $0x2e8] ss:$16 sps:$4 sm:$0xff]  }
  0xc3   : > { %1163 = vmatpush1.bf16.xpose.msra.mxu0 %v1917_v36  ;;  %v2014_v36 = vld [vmem:[%s2478_s12 + $0x10c] ss:$16 sps:$4 sm:$0xff]  }
  0xc4   : > { %1249 = vmatpush1.bf16.xpose.msra.mxu1 %v1918_v37  ;;  %1164 = vmatprep.subr.bf16.mxu0 %v1919_v38  ;;  %v2017_v37 = vld [vmem:[%s2478_s12 + $0x30c] ss:$16 sps:$4 sm:$0xff]   ;;  %v2012_v38 = vld [vmem:[%s2478_s12 + $0x108] ss:$16 sps:$4 sm:$0xff]  }
  0xc5   : > { %1250 = vmatprep.subr.bf16.mxu1 %v1921_v39  ;;  %v2015_v39 = vld [vmem:[%s2478_s12 + $0x308] ss:$16 sps:$4 sm:$0xff]  }
  0xcb   : > { %1165 = vmatpush1.bf16.xpose.msra.mxu0 %v1923_v40  ;;  %v2020_v40 = vld [vmem:[%s2478_s12 + $0x12c] ss:$16 sps:$4 sm:$0xff]  }
  0xcc   : > { %1251 = vmatpush1.bf16.xpose.msra.mxu1 %v1924_v41  ;;  %1166 = vmatprep.subr.bf16.mxu0 %v1925_v42  ;;  %v2023_v41 = vld [vmem:[%s2478_s12 + $0x32c] ss:$16 sps:$4 sm:$0xff]   ;;  %v2018_v42 = vld [vmem:[%s2478_s12 + $0x128] ss:$16 sps:$4 sm:$0xff]  }
  0xcd   : > { %1252 = vmatprep.subr.bf16.mxu1 %v1927_v43  ;;  %v2021_v43 = vld [vmem:[%s2478_s12 + $0x328] ss:$16 sps:$4 sm:$0xff]  }
  0xd3   : > { %1167 = vmatpush1.bf16.xpose.msra.mxu0 %v1929_v44  ;;  %v2026_v44 = vld [vmem:[%s2478_s12 + $0x14c] ss:$16 sps:$4 sm:$0xff]  }
  0xd4   : > { %1253 = vmatpush1.bf16.xpose.msra.mxu1 %v1930_v45  ;;  %1168 = vmatprep.subr.bf16.mxu0 %v1931_v46  ;;  %v2029_v45 = vld [vmem:[%s2478_s12 + $0x34c] ss:$16 sps:$4 sm:$0xff]   ;;  %v2024_v46 = vld [vmem:[%s2478_s12 + $0x148] ss:$16 sps:$4 sm:$0xff]  }
  0xd5   : > { %1254 = vmatprep.subr.bf16.mxu1 %v1933_v47  ;;  %v2027_v47 = vld [vmem:[%s2478_s12 + $0x348] ss:$16 sps:$4 sm:$0xff]  }
  0xdb   : > { %1169 = vmatpush1.bf16.xpose.msra.mxu0 %v1935_v48  ;;  %v2032_v48 = vld [vmem:[%s2478_s12 + $0x16c] ss:$16 sps:$4 sm:$0xff]  }
  0xdc   : > { %1255 = vmatpush1.bf16.xpose.msra.mxu1 %v1936_v49  ;;  %1170 = vmatprep.subr.bf16.mxu0 %v1937_v50  ;;  %v2035_v49 = vld [vmem:[%s2478_s12 + $0x36c] ss:$16 sps:$4 sm:$0xff]   ;;  %v2030_v50 = vld [vmem:[%s2478_s12 + $0x168] ss:$16 sps:$4 sm:$0xff]  }
  0xdd   : > { %1256 = vmatprep.subr.bf16.mxu1 %v1939_v51  ;;  %v2033_v51 = vld [vmem:[%s2478_s12 + $0x368] ss:$16 sps:$4 sm:$0xff]  }
  0xe3   : > { %1171 = vmatpush1.bf16.xpose.msra.mxu0 %v1941_v52  ;;  %v2038_v52 = vld [vmem:[%s2478_s12 + $0x18c] ss:$16 sps:$4 sm:$0xff]  }
  0xe4   : > { %1257 = vmatpush1.bf16.xpose.msra.mxu1 %v1942_v53  ;;  %1172 = vmatprep.subr.bf16.mxu0 %v1943_v54  ;;  %v2041_v53 = vld [vmem:[%s2478_s12 + $0x38c] ss:$16 sps:$4 sm:$0xff]   ;;  %v2036_v54 = vld [vmem:[%s2478_s12 + $0x188] ss:$16 sps:$4 sm:$0xff]  }
  0xe5   : > { %1258 = vmatprep.subr.bf16.mxu1 %v1945_v55  ;;  %v2039_v55 = vld [vmem:[%s2478_s12 + $0x388] ss:$16 sps:$4 sm:$0xff]  }
  0xeb   : > { %1173 = vmatpush1.bf16.xpose.msra.mxu0 %v1947_v56  ;;  %v2044_v56 = vld [vmem:[%s2478_s12 + $0x1ac] ss:$16 sps:$4 sm:$0xff]  }
  0xec   : > { %1259 = vmatpush1.bf16.xpose.msra.mxu1 %v1948_v57  ;;  %1174 = vmatprep.subr.bf16.mxu0 %v1949_v58  ;;  %v2047_v57 = vld [vmem:[%s2478_s12 + $0x3ac] ss:$16 sps:$4 sm:$0xff]   ;;  %v2042_v58 = vld [vmem:[%s2478_s12 + $0x1a8] ss:$16 sps:$4 sm:$0xff]  }
  0xed   : > { %1260 = vmatprep.subr.bf16.mxu1 %v1951_v59  ;;  %v2045_v59 = vld [vmem:[%s2478_s12 + $0x3a8] ss:$16 sps:$4 sm:$0xff]  }
  0xf3   : > { %1175 = vmatpush1.bf16.xpose.msra.mxu0 %v1953_v60  ;;  %v2050_v60 = vld [vmem:[%s2478_s12 + $0x1cc] ss:$16 sps:$4 sm:$0xff]  }
  0xf4   : > { %1261 = vmatpush1.bf16.xpose.msra.mxu1 %v1954_v61  ;;  %1176 = vmatprep.subr.bf16.mxu0 %v1955_v62  ;;  %v2053_v61 = vld [vmem:[%s2478_s12 + $0x3cc] ss:$16 sps:$4 sm:$0xff]   ;;  %v2048_v62 = vld [vmem:[%s2478_s12 + $0x1c8] ss:$16 sps:$4 sm:$0xff]  }
  0xf5   : > { %1262 = vmatprep.subr.bf16.mxu1 %v1957_v63  ;;  %v2051_v63 = vld [vmem:[%s2478_s12 + $0x3c8] ss:$16 sps:$4 sm:$0xff]  }
  0xfb   : > { %1177 = vmatpush1.bf16.xpose.msra.mxu0 %v1959_v0  ;;  %v2056_v0 = vld [vmem:[%s2478_s12 + $0x1ec] ss:$16 sps:$4 sm:$0xff]  }
  0xfc   : > { %1263 = vmatpush1.bf16.xpose.msra.mxu1 %v1960_v1  ;;  %1189 = vmatprep.subr.bf16.mxu0 %v1966_v2  ;;  %v2059_v1 = vld [vmem:[%s2478_s12 + $0x3ec] ss:$16 sps:$4 sm:$0xff]   ;;  %v2054_v2 = vld [vmem:[%s2478_s12 + $0x1e8] ss:$16 sps:$4 sm:$0xff]  }
  0xfd   : > { %1275 = vmatprep.subr.bf16.mxu1 %v1969_v3  ;;  %v2057_v3 = vld [vmem:[%s2478_s12 + $0x3e8] ss:$16 sps:$4 sm:$0xff]  }
 0x102   : > { %1179 = vmatmul.mubr.bf16.vlgmr.msra.gmra.mrb[0].mxu0 %v1961_v4 }
 0x103   : > { %1265 = vmatmul.mubr.bf16.vlgmr.msra.gmra.mrb[0].mxu1 %v1961_v4  ;;  %1190 = vmatpush1.bf16.xpose.msra.mxu0 %v1964_v5  ;;  %v2060_v4 = vld [vmem:[%s2471_s30 + $0x8] ss:$16 sps:$4 sm:$0xff]   ;;  %v346_v5 = vld [vmem:[#allocation2] sm:$0xff] }
 0x104   : > { %1276 = vmatpush1.bf16.xpose.msra.mxu1 %v1967_v6  ;;  %1191 = vmatprep.subr.bf16.mxu0 %v1972_v7  ;;  %v348_v6 = vld [vmem:[#allocation2 + $0x10] sm:$0xff]  ;;  %v347_v7 = vld [vmem:[#allocation2 + $0x8] sm:$0xff] }
 0x105   : > { %1277 = vmatprep.subr.bf16.mxu1 %v1975_v8  ;;  %1221 = vmatprep.mubr.bf16.mxu0 %v2062_v9  ;;  %v349_v8 = vld [vmem:[#allocation2 + $0x18] sm:$0xff] }
 0x106   : > { %1307 = vmatprep.mubr.bf16.mxu1 %v2062_v9 }
 0x10b   : > { %1192 = vmatpush1.bf16.xpose.msra.mxu0 %v1970_v10 }
 0x10c   : > { %1278 = vmatpush1.bf16.xpose.msra.mxu1 %v1973_v11  ;;  %1193 = vmatprep.subr.bf16.mxu0 %v1978_v12  ;;  %v350_v11 = vld [vmem:[#allocation2 + $0x20] sm:$0xff]  ;;  %v352_v12 = vld [vmem:[#allocation2 + $0x30] sm:$0xff] }
 0x10d   : > { %1279 = vmatprep.subr.bf16.mxu1 %v1981_v13 }
 0x113   : > { %1194 = vmatpush1.bf16.xpose.msra.mxu0 %v1976_v14 }
 0x114   : > { %1280 = vmatpush1.bf16.xpose.msra.mxu1 %v1979_v15  ;;  %1195 = vmatprep.subr.bf16.mxu0 %v1984_v16 }
 0x115   : > { %1281 = vmatprep.subr.bf16.mxu1 %v1987_v17  ;;  %v351_v17 = vld [vmem:[#allocation2 + $0x28] sm:$0xff] }
 0x11b   : > { %1196 = vmatpush1.bf16.xpose.msra.mxu0 %v1982_v18  ;;  %v353_v18 = vld [vmem:[#allocation2 + $0x38] sm:$0xff] }
 0x11c   : > { %1282 = vmatpush1.bf16.xpose.msra.mxu1 %v1985_v19  ;;  %1197 = vmatprep.subr.bf16.mxu0 %v1990_v20 }
 0x11d   : > { %1283 = vmatprep.subr.bf16.mxu1 %v1993_v21 }
 0x123   : > { %1198 = vmatpush1.bf16.xpose.msra.mxu0 %v1988_v22 }
 0x124   : > { %1284 = vmatpush1.bf16.xpose.msra.mxu1 %v1991_v23  ;;  %1199 = vmatprep.subr.bf16.mxu0 %v1996_v24 }
 0x125   : > { %1285 = vmatprep.subr.bf16.mxu1 %v1999_v25 }
 0x12b   : > { %1200 = vmatpush1.bf16.xpose.msra.mxu0 %v1994_v26 }
 0x12c   : > { %1286 = vmatpush1.bf16.xpose.msra.mxu1 %v1997_v27  ;;  %1201 = vmatprep.subr.bf16.mxu0 %v2002_v28 }
 0x12d   : > { %1287 = vmatprep.subr.bf16.mxu1 %v2005_v29 }
 0x133   : > { %1202 = vmatpush1.bf16.xpose.msra.mxu0 %v2000_v30  ;;  %v1356_v30 = vlaneseq (!%p1765_p6) }
 0x134   : > { %1288 = vmatpush1.bf16.xpose.msra.mxu1 %v2003_v31  ;;  %1203 = vmatprep.subr.bf16.mxu0 %v2008_v32 }
 0x135   : > { %1289 = vmatprep.subr.bf16.mxu1 %v2011_v33  ;;  %v1354_v33 = vld [vmem:[%s2770_s2] sm:$0xf] (!%p1765_p6) }
 0x13b   : > { %1204 = vmatpush1.bf16.xpose.msra.mxu0 %v2006_v34  ;;  %v1357_v34 = vshrl.u32 (!%p1765_p6), %v1356_v30, 7 }
 0x13c   : > { %1290 = vmatpush1.bf16.xpose.msra.mxu1 %v2009_v35  ;;  %1205 = vmatprep.subr.bf16.mxu0 %v2014_v36 }
 0x13d   : > { %1291 = vmatprep.subr.bf16.mxu1 %v2017_v37 }
 0x143   : > { %1206 = vmatpush1.bf16.xpose.msra.mxu0 %v2012_v38 }
 0x144   : > { %1292 = vmatpush1.bf16.xpose.msra.mxu1 %v2015_v39  ;;  %1207 = vmatprep.subr.bf16.mxu0 %v2020_v40 }
 0x145   : > { %1293 = vmatprep.subr.bf16.mxu1 %v2023_v41 }
 0x14b   : > { %1208 = vmatpush1.bf16.xpose.msra.mxu0 %v2018_v42  ;;  %v1358_v42 = vsub.s32 (!%p1765_p6), 0, %v1357_v34 }
 0x14c   : > { %1294 = vmatpush1.bf16.xpose.msra.mxu1 %v2021_v43  ;;  %1209 = vmatprep.subr.bf16.mxu0 %v2026_v44  ;;  %v1362_v43 = vsub.s32 (!%p1765_p6), 1, %v1357_v34  ;;  %v1366_v44 = vsub.s32 (!%p1765_p6), 2, %v1357_v34 }
 0x14d   : > { %1295 = vmatprep.subr.bf16.mxu1 %v2029_v45  ;;  %v1370_v45 = vsub.s32 (!%p1765_p6), 3, %v1357_v34 }
 0x153   : > { %1210 = vmatpush1.bf16.xpose.msra.mxu0 %v2024_v46 }
 0x154   : > { %1296 = vmatpush1.bf16.xpose.msra.mxu1 %v2027_v47  ;;  %1211 = vmatprep.subr.bf16.mxu0 %v2032_v48 }
 0x155   : > { %1297 = vmatprep.subr.bf16.mxu1 %v2035_v49 }
 0x15b   : > { %1212 = vmatpush1.bf16.xpose.msra.mxu0 %v2030_v50 }
 0x15c   : > { %1298 = vmatpush1.bf16.xpose.msra.mxu1 %v2033_v51  ;;  %1213 = vmatprep.subr.bf16.mxu0 %v2038_v52  ;;  %v1359_v51 = vrot.slane (!%p1765_p6), %v1354_v33, %v1358_v42  ;;  %v1363_v52 = vrot.slane (!%p1765_p6), %v1354_v33, %v1362_v43 }
 0x15d   : > { %1299 = vmatprep.subr.bf16.mxu1 %v2041_v53  ;;  %v1367_v53 = vrot.slane (!%p1765_p6), %v1354_v33, %v1366_v44 }
 0x163   : > { %1214 = vmatpush1.bf16.xpose.msra.mxu0 %v2036_v54  ;;  %v1371_v54 = vrot.slane (!%p1765_p6), %v1354_v33, %v1370_v45 }
 0x164   : > { %1300 = vmatpush1.bf16.xpose.msra.mxu1 %v2039_v55  ;;  %1215 = vmatprep.subr.bf16.mxu0 %v2044_v56 }
 0x165   : > { %1301 = vmatprep.subr.bf16.mxu1 %v2047_v57 }
 0x16b   : > { %1216 = vmatpush1.bf16.xpose.msra.mxu0 %v2042_v58 }
 0x16c   : > { %1302 = vmatpush1.bf16.xpose.msra.mxu1 %v2045_v59  ;;  %1217 = vmatprep.subr.bf16.mxu0 %v2050_v60 }
 0x16d   : > { %1303 = vmatprep.subr.bf16.mxu1 %v2053_v61 }
 0x173   : > { %1218 = vmatpush1.bf16.xpose.msra.mxu0 %v2048_v62 }
 0x174   : > { %1304 = vmatpush1.bf16.xpose.msra.mxu1 %v2051_v63  ;;  %1219 = vmatprep.subr.bf16.mxu0 %v2056_v0 }
 0x175   : > { %1305 = vmatprep.subr.bf16.mxu1 %v2059_v1 }
 0x17b   : > { %1220 = vmatpush1.bf16.xpose.msra.mxu0 %v2054_v2 }
 0x17c   : > { %1306 = vmatpush1.bf16.xpose.msra.mxu1 %v2057_v3 }
 0x182   : > { %1222 = vmatmul.mubr.bf16.vlgmr.msra.gmra.mrb[0].mxu0 %v2060_v4 }
 0x183   : > { %1308 = vmatmul.mubr.bf16.vlgmr.msra.gmra.mrb[0].mxu1 %v2060_v4 }
 0x255   : > { %v1223_v9 = vpop.f32.mrb[0].mxu0 }
 0x256   : > { %v1309_v10 = vpop.f32.mrb[0].mxu1  ;;  %v1318_v13 = vadd.f32 %v1223_v9, %v346_v5  ;;  %v1225_v15 = vpop.f32.mrb[1].mxu0  ;;  %1337 = sbr.rel (%p1765_p6) target bundleno = 643 (0x283), region = 56 }
 0x257   : > { %v1320_v14 = vadd.f32 %v1309_v10, %v348_v6  ;;  %v1311_v16 = vpop.f32.mrb[1].mxu1  ;;  %v1319_v19 = vadd.f32 %v1225_v15, %v347_v7  ;;  %v1227_v21 = vpop.f32.mrb[2].mxu0 }
 0x258   : > { %v1321_v20 = vadd.f32 %v1311_v16, %v349_v8  ;;  %v1313_v22 = vpop.f32.mrb[2].mxu1  ;;  %1326 = vst [vmem:[#allocation2] sm:$0xff] %v1318_v13  ;;  %v1322_v23 = vadd.f32 %v1227_v21, %v350_v11  ;;  %v1229_v25 = vpop.f32.mrb[3].mxu0 }
 0x259   : > { %1328 = vst [vmem:[#allocation2 + $0x10] sm:$0xff] %v1320_v14  ;;  %v1324_v24 = vadd.f32 %v1313_v22, %v352_v12  ;;  %v1315_v26 = vpop.f32.mrb[3].mxu1  ;;  %1327 = vst [vmem:[#allocation2 + $0x8] sm:$0xff] %v1319_v19  ;;  %v1323_v27 = vadd.f32 %v1229_v25, %v351_v17  ;;  %v1448_v17 = vld [vmem:[#allocation8] sm:$0xff] (!%p1765_p6)  ;;  %v1449_v22 = vld [vmem:[#allocation8 + $0x8] sm:$0xff] (!%p1765_p6) }
 0x25a   : > { %1329 = vst [vmem:[#allocation2 + $0x18] sm:$0xff] %v1321_v20  ;;  %v1325_v28 = vadd.f32 %v1315_v26, %v353_v18  ;;  %1330 = vst [vmem:[#allocation2 + $0x20] sm:$0xff] %v1322_v23 }
 0x25b   : > { %1332 = vst [vmem:[#allocation2 + $0x30] sm:$0xff] %v1324_v24  ;;  %1331 = vst [vmem:[#allocation2 + $0x28] sm:$0xff] %v1323_v27 }
 0x25c   : > { %1333 = vst [vmem:[#allocation2 + $0x38] sm:$0xff] %v1325_v28  ;;  %v1450_v28 = vld [vmem:[#allocation8 + $0x10] sm:$0xff] (!%p1765_p6) }
 0x25f   : > { %v1338_v29 = vld [vmem:[#allocation2] sm:$0xff] }
 0x260   : > { %v1339_v31 = vld [vmem:[#allocation2 + $0x8] sm:$0xff]  ;;  %v1340_v32 = vld [vmem:[#allocation2 + $0x10] sm:$0xff]  ;;  %v1346_v36 = vmul.f32 5.0, %v1338_v29 }
 0x261   : > { %v1341_v35 = vld [vmem:[#allocation2 + $0x18] sm:$0xff]  ;;  %v1347_v37 = vmul.f32 5.0, %v1339_v31  ;;  %v1348_v38 = vmul.f32 5.0, %v1340_v32  ;;  %v1342_v40 = vld [vmem:[#allocation2 + $0x20] sm:$0xff] }
 0x262   : > { %v1349_v39 = vmul.f32 5.0, %v1341_v35  ;;  %v1343_v41 = vld [vmem:[#allocation2 + $0x28] sm:$0xff]  ;;  %v1344_v46 = vld [vmem:[#allocation2 + $0x30] sm:$0xff]  ;;  %v1350_v47 = vmul.f32 5.0, %v1342_v40  ;;  %v1376_v56 = vadd.f32 %v1359_v51, %v1346_v36  ;;  %v1451_v35 = vld [vmem:[#allocation8 + $0x18] sm:$0xff] }
 0x263   : > { %v1351_v48 = vmul.f32 5.0, %v1343_v41  ;;  %v1352_v49 = vmul.f32 5.0, %v1344_v46  ;;  %v1345_v50 = vld [vmem:[#allocation2 + $0x38] sm:$0xff]  ;;  %v1377_v57 = vadd.f32 %v1363_v52, %v1347_v37  ;;  %v1378_v58 = vadd.f32 %v1367_v53, %v1348_v38  ;;  %v1452_v41 = vld [vmem:[#allocation8 + $0x20] sm:$0xff] }
 0x264   : > { %v1353_v55 = vmul.f32 5.0, %v1345_v50  ;;  %v1379_v59 = vadd.f32 %v1371_v54, %v1349_v39  ;;  %v1380_v60 = vadd.f32 %v1359_v51, %v1350_v47  ;;  %v2625_v62 = vmax.f32 %v1376_v56, 0.0 }
 0x265   : > { %v1381_v61 = vadd.f32 %v1363_v52, %v1351_v48  ;;  %v2627_v63 = vmax.f32 %v1377_v57, 0.0  ;;  %v2629_v0 = vmax.f32 %v1378_v58, 0.0  ;;  %v1382_v1 = vadd.f32 %v1367_v53, %v1352_v49  ;;  %v1453_v48 = vld [vmem:[#allocation8 + $0x28] sm:$0xff] }
 0x266   : > { %v2631_v2 = vmax.f32 %v1379_v59, 0.0  ;;  %v1383_v3 = vadd.f32 %v1371_v54, %v1353_v55  ;;  %2063 = vrsqrt.f32 %v2625_v62  ;;  %v2634_v4 = vmax.f32 %v1380_v60, 0.0  ;;  %v1454_v59 = vld [vmem:[#allocation8 + $0x30] sm:$0xff] }
 0x267   : > { %2065 = vrsqrt.f32 %v2627_v63  ;;  %v2637_v5 = vmax.f32 %v1381_v61, 0.0  ;;  %v2640_v6 = vmax.f32 %v1382_v1, 0.0  ;;  %vm1394_vm0 = vcmp.eq.f32.partialorder %v2625_v62, inf }
 0x268   : > { %2067 = vrsqrt.f32 %v2629_v0  ;;  %v2643_v7 = vmax.f32 %v1383_v3, 0.0  ;;  %vm1396_vm1 = vcmp.eq.f32.partialorder %v2625_v62, 0.0  ;;  %v1397_v8 = vand.u32 2147483648, %v2625_v62 }
 0x269   : > { %2069 = vrsqrt.f32 %v2631_v2  ;;  %vm1401_vm2 = vcmp.eq.f32.partialorder %v2627_v63, inf  ;;  %vm1403_vm3 = vcmp.eq.f32.partialorder %v2627_v63, 0.0  ;;  %v1404_v9 = vand.u32 2147483648, %v2627_v63 }
 0x26a   : > { %2071 = vrsqrt.f32 %v2634_v4  ;;  %vm1408_vm4 = vcmp.eq.f32.partialorder %v2629_v0, inf  ;;  %vm1410_vm5 = vcmp.eq.f32.partialorder %v2629_v0, 0.0  ;;  %v1411_v10 = vand.u32 2147483648, %v2629_v0 }
 0x26b   : > { %2073 = vrsqrt.f32 %v2637_v5  ;;  %vm1415_vm6 = vcmp.eq.f32.partialorder %v2631_v2, inf  ;;  %vm1417_vm7 = vcmp.eq.f32.partialorder %v2631_v2, 0.0  ;;  %v1418_v12 = vand.u32 2147483648, %v2631_v2 }
 0x26c   : > { %2075 = vrsqrt.f32 %v2640_v6  ;;  %vm1422_vm8 = vcmp.eq.f32.partialorder %v2634_v4, inf  ;;  %vm1424_vm9 = vcmp.eq.f32.partialorder %v2634_v4, 0.0  ;;  %v1425_v15 = vand.u32 2147483648, %v2634_v4 }
 0x26d   : > { %2077 = vrsqrt.f32 %v2643_v7  ;;  %vm1429_vm10 = vcmp.eq.f32.partialorder %v2637_v5, inf  ;;  %vm1431_vm11 = vcmp.eq.f32.partialorder %v2637_v5, 0.0  ;;  %v1432_v19 = vand.u32 2147483648, %v2637_v5 }
 0x26e   : > { %vm1436_vm12 = vcmp.eq.f32.partialorder %v2640_v6, inf  ;;  %vm1438_vm13 = vcmp.eq.f32.partialorder %v2640_v6, 0.0  ;;  %v1439_v24 = vand.u32 2147483648, %v2640_v6  ;;  %vm1443_vm14 = vcmp.eq.f32.partialorder %v2643_v7, inf }
 0x26f   : > { %v1446_v30 = vand.u32 2147483648, %v2643_v7  ;;  %vm1445_vm15 = vcmp.eq.f32.partialorder %v2643_v7, 0.0 }
 0x270   : > { %v2064_v11 = vpop.eup %2063 }
 0x271   : > { %v2066_v13 = vpop.eup %2065  ;;  %v1393_v14 = vmul.f32 %v2064_v11, %v2625_v62 }
 0x272   : > { %v2068_v16 = vpop.eup %2067  ;;  %v1400_v18 = vmul.f32 %v2066_v13, %v2627_v63 }
 0x273   : > { %v2070_v20 = vpop.eup %2069  ;;  %v1395_v21 = vsel %vm1394_vm0, %v2625_v62, %v1393_v14  ;;  %v1407_v23 = vmul.f32 %v2068_v16, %v2629_v0 }
 0x274   : > { %v2072_v25 = vpop.eup %2071  ;;  %v1398_v26 = vsel %vm1396_vm1, %v1397_v8, %v1395_v21  ;;  %v1402_v27 = vsel %vm1401_vm2, %v2627_v63, %v1400_v18  ;;  %v1414_v29 = vmul.f32 %v2070_v20, %v2631_v2 }
 0x275   : > { %v2074_v31 = vpop.eup %2073  ;;  %v1456_v32 = vmul.f32 %v1448_v17, %v1398_v26  ;;  %v1405_v33 = vsel %vm1403_vm3, %v1404_v9, %v1402_v27  ;;  %v1409_v34 = vsel %vm1408_vm4, %v2629_v0, %v1407_v23  ;;  %v1421_v36 = vmul.f32 %v2072_v25, %v2634_v4 }
 0x276   : > { %v2076_v37 = vpop.eup %2075  ;;  %v1457_v38 = vmul.f32 %v1449_v22, %v1405_v33  ;;  %v1412_v39 = vsel %vm1410_vm5, %v1411_v10, %v1409_v34  ;;  %v1416_v40 = vsel %vm1415_vm6, %v2631_v2, %v1414_v29  ;;  %v1428_v42 = vmul.f32 %v2074_v31, %v2637_v5 }
 0x277   : > { %v2078_v43 = vpop.eup %2077  ;;  %v1464_v44 = vadd.f32 %v1456_v32, %v2625_v62  ;;  %v1458_v45 = vmul.f32 %v1450_v28, %v1412_v39  ;;  %v1419_v46 = vsel %vm1417_vm7, %v1418_v12, %v1416_v40  ;;  %v1423_v47 = vsel %vm1422_vm8, %v2634_v4, %v1421_v36 }
 0x278   : > { %v1465_v49 = vadd.f32 %v1457_v38, %v2627_v63  ;;  %v1459_v50 = vmul.f32 %v1451_v35, %v1419_v46  ;;  %v1426_v51 = vsel %vm1424_vm9, %v1425_v15, %v1423_v47  ;;  %v1430_v52 = vsel %vm1429_vm10, %v2637_v5, %v1428_v42  ;;  %v1455_v63 = vld [vmem:[#allocation8 + $0x38] sm:$0xff] }
 0x279   : > { %1472 = vst [vmem:[#allocation9] sm:$0xff] %v1464_v44  ;;  %v1466_v53 = vadd.f32 %v1458_v45, %v2629_v0  ;;  %v1460_v54 = vmul.f32 %v1452_v41, %v1426_v51  ;;  %v1433_v55 = vsel %vm1431_vm11, %v1432_v19, %v1430_v52  ;;  %v1435_v56 = vmul.f32 %v2076_v37, %v2640_v6 }
 0x27a   : > { %1473 = vst [vmem:[#allocation9 + $0x8] sm:$0xff] %v1465_v49  ;;  %v1467_v57 = vadd.f32 %v1459_v50, %v2631_v2  ;;  %v1461_v58 = vmul.f32 %v1453_v48, %v1433_v55  ;;  %v1442_v60 = vmul.f32 %v2078_v43, %v2643_v7 }
 0x27b   : > { %1474 = vst [vmem:[#allocation9 + $0x10] sm:$0xff] %v1466_v53  ;;  %v1468_v61 = vadd.f32 %v1460_v54, %v2634_v4  ;;  %v1437_v62 = vsel %vm1436_vm12, %v2640_v6, %v1435_v56 }
 0x27c   : > { %1475 = vst [vmem:[#allocation9 + $0x18] sm:$0xff] %v1467_v57  ;;  %v1469_v0 = vadd.f32 %v1461_v58, %v2637_v5  ;;  %v1440_v1 = vsel %vm1438_vm13, %v1439_v24, %v1437_v62  ;;  %v1444_v2 = vsel %vm1443_vm14, %v2643_v7, %v1442_v60 }
 0x27d   : > { %1476 = vst [vmem:[#allocation9 + $0x20] sm:$0xff] %v1468_v61  ;;  %v1462_v3 = vmul.f32 %v1454_v59, %v1440_v1  ;;  %v1447_v8 = vsel %vm1445_vm15, %v1446_v30, %v1444_v2 }
 0x27e   : > { %1477 = vst [vmem:[#allocation9 + $0x28] sm:$0xff] %v1469_v0  ;;  %v1463_v4 = vmul.f32 %v1455_v63, %v1447_v8 }
 0x27f   : > { %v1470_v9 = vadd.f32 %v1462_v3, %v2640_v6 }
 0x280   : > { %v1471_v10 = vadd.f32 %v1463_v4, %v2643_v7 }
 0x281   : > { %1478 = vst [vmem:[#allocation9 + $0x30] sm:$0xff] %v1470_v9 }
 0x282   : > { %1479 = vst [vmem:[#allocation9 + $0x38] sm:$0xff] %v1471_v10 }
 0x283 PF: > { %p1806_p8 = scmp.eq.s32.totalorder %s2322_s21, 1  ;;  %s2265_s18 = smov [#allocation9]  }
 0x284   : > { %s1492_s13 = sshll.u32 %s2265_s18, 4  ;;  %s1493_s13 = int_to_ptr.vmem [resolvable:$true] %s1492_s13 }
 0x285   : > { %s2167_s15 = scalar_lea.vmem %s1493_s13, 1024  ;;  %p2174_p0 = scmp.lt.s32.totalorder %s1493_s13, %s1493_s13 }
 0x286   : > { %p2168_p13 = scmp.ne.s32.totalorder %s1493_s13, %s2167_s15  ;;  %p2175_p4 = scmp.lt.s32.totalorder %s2167_s15, %s2167_s15 }
 0x288   : > { %p2169_p1 = pnand %p2168_p13, %p1806_p8  ;;  %p2176_p7 = por %p2175_p4, %p2174_p0 }
 0x28a   : > { %p2170_p2 = pneg %p2169_p1 }
 0x28c   : > { %p2177_p9 = pnand %p2176_p7, %p2170_p2 }
 0x28e   : > { %2180 = shalt.err (!%p2177_p9)
}
 0x28f   : > { %s2181_s11 = scalar_lea.hbm %s2772_s4, 1024 }
 0x290   : > { %p2182_p12 = scmp.ne.s32.totalorder %s2772_s4, %s2181_s11  ;;  %p2187_p10 = scmp.lt.u32.totalorder %s2181_s11, %s2772_s4 }
 0x292   : > { %p2183_p5 = pnand %p2182_p12, %p1806_p8 }
 0x294   : > { %p2184_p11 = pneg %p2183_p5 }
 0x296   : > { %p2189_p3 = pnand %p2187_p10, %p2184_p11 }
 0x298   : > { %2192 = shalt.err (!%p2189_p3)
}
 0x299   : > { %s2266_s7 = smov 512   ;;  %s2267_s3 = smov 32  }
 0x29a   : > { %1789 = dma.vmem_to_hbm [thread:$0]  (%p1806_p8), %s1493_s13, 1024, %s2772_s4, [#allocation5], %s2266_s7, %s2266_s7, %s2267_s3  }
 0x29b   : > { %2230 = dma.done.wait (%p1806_p8), [#allocation5], 1024  }
 0x29c   : > { %2232 = vsyncadd (%p1806_p8), [#allocation5], 4294966272 }
 0x29d PF: > { %s21_s20 = sadd.s32 1, %s2255_s20   ;;  %s2790_s15 = smov %s2239_s16 }
 0x29e   : > { %p18_p6 = scmp.ge.s32.totalorder %s21_s20, 4   ;;  %s2791_s16 = smov %s2243_s17 }
 0x29f   : > { %s2792_s17 = smov %s2393_s10  ;;  %s2793_s18 = smov %s2251_s19 }
 0x2a0   : > { %s2794_s19 = smov %s2796_s29  ;;  %20 = sbr.rel (!%p18_p6) target bundleno = 10 (0xa), region = 103 }
 0x2a7   :  { %1508 = vsyncpa [#allocation4], 1 }
 0x2a8   :  { %1510 = vsyncpa [#allocation4 + $0x1], 1 }
 0x2a9   :  { %1511 = vsyncpa [#allocation7], 1 }
 0x2aa   :  { %1513 = vsyncpa [#allocation7 + $0x1], 1 }
 0x2ab   :  { %1514 = vsyncpa [#allocation5], 1 }
 0x2ac   :  { %1516 = vsyncpa [#allocation5 + $0x1], 1 }

</bundles_post_ra>
